<compile_context>
chip_gen: v6e
topology: v6e:2x2x1
jax: 0.10.0
libtpu: 0.0.40
codegen_flags: <defaults>
</compile_context>

<pallas_src>
import numpy as np
import jax
import jax.numpy as jnp
from jax.experimental import pallas as pl
from jax.experimental.pallas import tpu as pltpu

IGNORE_LB = 255
EPS = 1e-7


def _backce_kernel(scalar_ref, labels_ref, logits_ref, loss_out, cnt_out,
                   loss_acc, cnt_acc):
    # logits block: (C, S, 128)  -- channels on the cheap leading axis,
    #                               pixels dense on (sublane=S, lane=128)
    # labels block: (S, 128) int32
    # scalar_ref (SMEM): [flag, hw, absent_0, ..., absent_{C-1}]
    t = pl.program_id(1)

    @pl.when(t == 0)
    def _():
        loss_acc[...] = jnp.zeros_like(loss_acc)
        cnt_acc[...] = jnp.zeros_like(cnt_acc)

    flag = scalar_ref[0] > 0      # some class in [0, C) is absent from labels
    hw = scalar_ref[1]            # real (unpadded) pixels per batch element

    labels = labels_ref[...]                          # (S, 128) int32
    c, s, _ = logits_ref.shape

    # Channel softmax as a C-way unrolled elementwise chain (VPU max/add,
    # EUP exp). No cross-lane / cross-sublane reduce in the hot loop.
    rows = [logits_ref[ch].astype(jnp.float32) for ch in range(c)]  # (S,128)
    m = rows[0]
    for r in rows[1:]:
        m = jnp.maximum(m, r)
    es = [jnp.exp(r - m) for r in rows]
    sum_e = es[0]
    for e in es[1:]:
        sum_e = sum_e + e

    # Unnormalized prob of the pixel's own class and of the "background" lump.
    e_sel = jnp.zeros_like(sum_e)
    e_back = jnp.zeros_like(sum_e)
    for ch in range(c):
        e_sel = jnp.where(labels == ch, es[ch], e_sel)
        absent_ch = (scalar_ref[2 + ch] > 0).astype(jnp.float32)
        e_back = e_back + absent_ch * es[ch]

    is_ign = labels == IGNORE_LB
    e_pick = jnp.where(is_ign, e_back, e_sel)

    # Mask the OOB garbage of a (possibly partial) tail tile.
    row = jax.lax.broadcasted_iota(jnp.int32, (s, 128), 0)
    lane = jax.lax.broadcasted_iota(jnp.int32, (s, 128), 1)
    pix = (t * s + row) * 128 + lane
    in_range = pix < hw

    # 255-labelled pixels map to the background channel iff Flag, else ignored.
    valid = jnp.logical_and(jnp.logical_or(jnp.logical_not(is_ign), flag),
                            in_range)

    # -log(p + eps) with p = e_pick / sum_e, division-free and eps-exact:
    #   -log(e_pick / sum_e + eps) = log(sum_e) - log(e_pick + eps * sum_e)
    contrib = jnp.log(sum_e) - jnp.log(e_pick + EPS * sum_e)

    loss_acc[...] += jnp.where(valid, contrib, 0.0)
    cnt_acc[...] += valid.astype(jnp.float32)

    @pl.when(t == pl.num_programs(1) - 1)
    def _():
        # Per-batch partial sums, broadcast into the lane-dense (1,128) block.
        loss_out[...] = jnp.full((1, 128), jnp.sum(loss_acc[...]),
                                 dtype=jnp.float32)
        cnt_out[...] = jnp.full((1, 128), jnp.sum(cnt_acc[...]),
                                dtype=jnp.float32)


def backce_loss(logits_nchw, labels, num_classes, max_rows=512):
    """BackCELoss forward. `logits_nchw` is consumed directly (no transpose);
    `labels` is (N, H, W) integer."""
    n, c, h, w = logits_nchw.shape
    assert c == num_classes
    hw = h * w

    # Class presence / Flag via a tiny histogram (no P x C matrix). Labels
    # >= C (incl. 255) land in an overflow bucket and are ignored.
    lab_flat = labels.reshape(-1).astype(jnp.int32)
    idx = jnp.clip(lab_flat, 0, num_classes)
    counts = jnp.zeros((num_classes + 1,), jnp.int32).at[idx].add(1)
    present = counts[:num_classes] > 0
    absent = jnp.logical_not(present)
    flag = jnp.any(absent).astype(jnp.int32)

    # Pixels-dense layout: (N, C, HW) -> (N, C, R, 128).  NCHW is already
    # channel-major, so only trailing-dim (layout-preserving) reshapes.
    pad = (-hw) % 128
    x = logits_nchw.reshape(n, c, hw)
    lab = labels.reshape(n, hw).astype(jnp.int32)
    if pad:
        # TODO(synk): rare path (H*W not a multiple of 128) costs one copy.
        x = jnp.pad(x, ((0, 0), (0, 0), (0, pad)))
        lab = jnp.pad(lab, ((0, 0), (0, pad)), constant_values=IGNORE_LB)
    r = (hw + pad) // 128
    x = x.reshape(n, c, r, 128)
    lab = lab.reshape(n, r, 128)

    # ~0.5-1 MiB of logits per grid step, sublane-aligned (S multiple of 8
    # or equal to the full row count).
    s_max = max(8, min(max_rows, ((4 << 20) // (c * 128 * 4 * 2)) // 8 * 8))
    s = min(s_max, r)
    t = pl.cdiv(r, s)

    scalars = jnp.concatenate([
        jnp.stack([flag, jnp.asarray(hw, jnp.int32)]),
        absent.astype(jnp.int32),
    ])

    loss_p, cnt_p = pl.pallas_call(
        _backce_kernel,
        out_shape=(jax.ShapeDtypeStruct((n, 1, 128), jnp.float32),
                   jax.ShapeDtypeStruct((n, 1, 128), jnp.float32)),
        grid_spec=pltpu.PrefetchScalarGridSpec(
            num_scalar_prefetch=1,
            grid=(n, t),
            in_specs=[
                pl.BlockSpec((None, s, 128),
                             lambda b, i, sc: (b, i, 0)),          # labels
                pl.BlockSpec((None, c, s, 128),
                             lambda b, i, sc: (b, 0, i, 0)),        # logits
            ],
            out_specs=[
                pl.BlockSpec((None, 1, 128), lambda b, i, sc: (b, 0, 0)),
                pl.BlockSpec((None, 1, 128), lambda b, i, sc: (b, 0, 0)),
            ],
            scratch_shapes=[pltpu.VMEM((s, 128), jnp.float32),
                            pltpu.VMEM((s, 128), jnp.float32)],
        ),
        compiler_params=pltpu.CompilerParams(
            # batch axis can be split across TensorCores (v7x megacore);
            # the pixel-tile axis carries the accumulator -> arbitrary.
            dimension_semantics=("parallel", "arbitrary")),
    )(scalars, lab, x)

    # Per-batch partial sums (broadcast across lanes); NaN if nothing valid,
    # matching NLLLoss(reduction='mean') over an empty set.
    return jnp.sum(loss_p[:, 0, 0]) / jnp.sum(cnt_p[:, 0, 0])


def _ref_backce(logits, labels, num_classes, ignore_lb=IGNORE_LB):
    """Faithful numpy translation of BackCELoss.forward (for verification)."""
    logits = np.asarray(logits, np.float64)
    labels = np.asarray(labels)
    e = np.exp(logits - logits.max(axis=1, keepdims=True))
    probs = e / e.sum(axis=1, keepdims=True)
    total = np.unique(labels)
    fore, back = [], []
    for l in range(num_classes):
        if l in total:
            fore.append(probs[:, l:l + 1])
        else:
            back.append(probs[:, l:l + 1])
    flag = len(fore) != num_classes
    if flag:
        fore.append(sum(back))
    new = labels.astype(np.int64).copy()
    for i, l in enumerate(total):
        if flag or l != ignore_lb:
            new[labels == l] = i
    probs = np.concatenate(fore, axis=1)
    logp = np.log(probs + EPS)
    mask = new != ignore_lb
    safe = np.clip(new, 0, probs.shape[1] - 1)
    sel = np.take_along_axis(logp, safe[:, None, :, :], axis=1)[:, 0]
    return -(sel * mask).sum() / mask.sum()


if __name__ == "__main__":
    key = jax.random.PRNGKey(0)
    k1, k2 = jax.random.split(key)
    N, C, H, W = 2, 4, 16, 16
    logits = jax.random.normal(k1, (N, C, H, W), dtype=jnp.float32)
    # labels drawn from {0, 1, 3, 255}: class 2 absent (exercises the
    # background-lump "Flag" branch), 255 exercises the ignore/remap path.
    choices = jnp.array([0, 1, 3, 255, 1, 0], dtype=jnp.int32)
    idx = jax.random.randint(k2, (N, H, W), 0, choices.shape[0])
    labels = choices[idx]

    loss = backce_loss(logits, labels, num_classes=C)
    loss = jax.block_until_ready(loss)

    ref = _ref_backce(np.array(logits), np.array(labels), C)
    assert np.allclose(float(loss), float(ref), rtol=1e-4, atol=1e-5), \
        (float(loss), float(ref))
    print("KERNEL_OK")
</pallas_src>

<mosaic_0001>
module attributes {stable_mosaic.version = 11 : i64} {
  func.func @_backce_kernel(%arg0: i32, %arg1: i32, %arg2: memref<6xi32, #tpu.memory_space<smem>>, %arg3: memref<1x2x128xi32, #tpu.memory_space<vmem>>, %arg4: memref<1x4x2x128xf32, #tpu.memory_space<vmem>>, %arg5: memref<1x1x128xf32, #tpu.memory_space<vmem>>, %arg6: memref<1x1x128xf32, #tpu.memory_space<vmem>>, %arg7: memref<2x128xf32, #tpu.memory_space<vmem>>, %arg8: memref<2x128xf32, #tpu.memory_space<vmem>>) attributes {dimension_semantics = [#tpu.dimension_semantics<parallel>, #tpu.dimension_semantics<arbitrary>], iteration_bounds = array<i64: 2, 1>, scalar_prefetch = 1 : i64, scratch_operands = 2 : i64, tpu.core_type = #tpu.core_type<tc>, window_params = [{transform_indices = @transform_0, window_bounds = array<i64: 1, 2, 128>}, {transform_indices = @transform_1, window_bounds = array<i64: 1, 4, 2, 128>}, {transform_indices = @transform_2, window_bounds = array<i64: 1, 1, 128>}, {transform_indices = @transform_3, window_bounds = array<i64: 1, 1, 128>}]} {
    %c0_i32 = arith.constant 0 : i32
    %0 = arith.cmpi eq, %arg1, %c0_i32 : i32
    %1 = arith.extui %0 : i1 to i32
    %c0_i32_0 = arith.constant 0 : i32
    %2 = arith.cmpi ne, %1, %c0_i32_0 : i32
    scf.if %2 {
      %cst_41 = arith.constant 0.000000e+00 : f32
      %108 = vector.broadcast %cst_41 : f32 to vector<2x128xf32>
      %c0_42 = arith.constant 0 : index
      %c0_43 = arith.constant 0 : index
      %109 = vector.load %arg7[%c0_42, %c0_43] : memref<2x128xf32, #tpu.memory_space<vmem>>, vector<2x128xf32>
      tpu.vector_store %arg7[%c0_42, %c0_43], %108 {strides = array<i32>} : memref<2x128xf32, #tpu.memory_space<vmem>>, vector<2x128xf32>,
      %cst_44 = arith.constant 0.000000e+00 : f32
      %110 = vector.broadcast %cst_44 : f32 to vector<2x128xf32>
      %c0_45 = arith.constant 0 : index
      %c0_46 = arith.constant 0 : index
      %111 = vector.load %arg8[%c0_45, %c0_46] : memref<2x128xf32, #tpu.memory_space<vmem>>, vector<2x128xf32>
      tpu.vector_store %arg8[%c0_45, %c0_46], %110 {strides = array<i32>} : memref<2x128xf32, #tpu.memory_space<vmem>>, vector<2x128xf32>,
    } else {
    }
    %c0 = arith.constant 0 : index
    %3 = memref.load %arg2[%c0] : memref<6xi32, #tpu.memory_space<smem>>
    %c0_i32_1 = arith.constant 0 : i32
    %4 = arith.cmpi sgt, %3, %c0_i32_1 : i32
    %c1 = arith.constant 1 : index
    %5 = memref.load %arg2[%c1] : memref<6xi32, #tpu.memory_space<smem>>
    %c0_2 = arith.constant 0 : index
    %c0_3 = arith.constant 0 : index
    %c0_4 = arith.constant 0 : index
    %6 = vector.load %arg3[%c0_2, %c0_3, %c0_4] : memref<1x2x128xi32, #tpu.memory_space<vmem>>, vector<1x2x128xi32>
    %7 = vector.shape_cast %6 : vector<1x2x128xi32> to vector<2x128xi32>
    %c0_5 = arith.constant 0 : index
    %c0_6 = arith.constant 0 : index
    %c0_7 = arith.constant 0 : index
    %c0_8 = arith.constant 0 : index
    %8 = vector.load %arg4[%c0_5, %c0_6, %c0_7, %c0_8] : memref<1x4x2x128xf32, #tpu.memory_space<vmem>>, vector<1x1x2x128xf32>
    %9 = vector.shape_cast %8 : vector<1x1x2x128xf32> to vector<2x128xf32>
    %c0_9 = arith.constant 0 : index
    %c1_10 = arith.constant 1 : index
    %c0_11 = arith.constant 0 : index
    %c0_12 = arith.constant 0 : index
    %10 = vector.load %arg4[%c0_9, %c1_10, %c0_11, %c0_12] : memref<1x4x2x128xf32, #tpu.memory_space<vmem>>, vector<1x1x2x128xf32>
    %11 = vector.shape_cast %10 : vector<1x1x2x128xf32> to vector<2x128xf32>
    %c0_13 = arith.constant 0 : index
    %c2 = arith.constant 2 : index
    %c0_14 = arith.constant 0 : index
    %c0_15 = arith.constant 0 : index
    %12 = vector.load %arg4[%c0_13, %c2, %c0_14, %c0_15] : memref<1x4x2x128xf32, #tpu.memory_space<vmem>>, vector<1x1x2x128xf32>
    %13 = vector.shape_cast %12 : vector<1x1x2x128xf32> to vector<2x128xf32>
    %c0_16 = arith.constant 0 : index
    %c3 = arith.constant 3 : index
    %c0_17 = arith.constant 0 : index
    %c0_18 = arith.constant 0 : index
    %14 = vector.load %arg4[%c0_16, %c3, %c0_17, %c0_18] : memref<1x4x2x128xf32, #tpu.memory_space<vmem>>, vector<1x1x2x128xf32>
    %15 = vector.shape_cast %14 : vector<1x1x2x128xf32> to vector<2x128xf32>
    %16 = arith.maximumf %9, %11 : vector<2x128xf32>
    %17 = arith.maximumf %16, %13 : vector<2x128xf32>
    %18 = arith.maximumf %17, %15 : vector<2x128xf32>
    %19 = arith.subf %9, %18 : vector<2x128xf32>
    %20 = math.exp %19 : vector<2x128xf32>
    %21 = arith.subf %11, %18 : vector<2x128xf32>
    %22 = math.exp %21 : vector<2x128xf32>
    %23 = arith.subf %13, %18 : vector<2x128xf32>
    %24 = math.exp %23 : vector<2x128xf32>
    %25 = arith.subf %15, %18 : vector<2x128xf32>
    %26 = math.exp %25 : vector<2x128xf32>
    %27 = arith.addf %20, %22 : vector<2x128xf32>
    %28 = arith.addf %27, %24 : vector<2x128xf32>
    %29 = arith.addf %28, %26 : vector<2x128xf32>
    %cst = arith.constant 0.000000e+00 : f32
    %30 = vector.broadcast %cst : f32 to vector<2x128xf32>
    %cst_19 = arith.constant 0.000000e+00 : f32
    %31 = vector.broadcast %cst_19 : f32 to vector<2x128xf32>
    %c0_i32_20 = arith.constant 0 : i32
    %32 = vector.broadcast %c0_i32_20 : i32 to vector<2x128xi32>
    %33 = arith.cmpi eq, %7, %32 : vector<2x128xi32>
    %34 = arith.select %33, %20, %30 : vector<2x128xi1>, vector<2x128xf32>
    %c2_21 = arith.constant 2 : index
    %35 = memref.load %arg2[%c2_21] : memref<6xi32, #tpu.memory_space<smem>>
    %c0_i32_22 = arith.constant 0 : i32
    %36 = arith.cmpi sgt, %35, %c0_i32_22 : i32
    %37 = arith.extui %36 : i1 to i32
    %38 = arith.sitofp %37 : i32 to f32
    %39 = vector.broadcast %38 : f32 to vector<2x128xf32>
    %40 = arith.mulf %39, %20 : vector<2x128xf32>
    %41 = arith.addf %31, %40 : vector<2x128xf32>
    %c1_i32 = arith.constant 1 : i32
    %42 = vector.broadcast %c1_i32 : i32 to vector<2x128xi32>
    %43 = arith.cmpi eq, %7, %42 : vector<2x128xi32>
    %44 = arith.select %43, %22, %34 : vector<2x128xi1>, vector<2x128xf32>
    %c3_23 = arith.constant 3 : index
    %45 = memref.load %arg2[%c3_23] : memref<6xi32, #tpu.memory_space<smem>>
    %c0_i32_24 = arith.constant 0 : i32
    %46 = arith.cmpi sgt, %45, %c0_i32_24 : i32
    %47 = arith.extui %46 : i1 to i32
    %48 = arith.sitofp %47 : i32 to f32
    %49 = vector.broadcast %48 : f32 to vector<2x128xf32>
    %50 = arith.mulf %49, %22 : vector<2x128xf32>
    %51 = arith.addf %41, %50 : vector<2x128xf32>
    %c2_i32 = arith.constant 2 : i32
    %52 = vector.broadcast %c2_i32 : i32 to vector<2x128xi32>
    %53 = arith.cmpi eq, %7, %52 : vector<2x128xi32>
    %54 = arith.select %53, %24, %44 : vector<2x128xi1>, vector<2x128xf32>
    %c4 = arith.constant 4 : index
    %55 = memref.load %arg2[%c4] : memref<6xi32, #tpu.memory_space<smem>>
    %c0_i32_25 = arith.constant 0 : i32
    %56 = arith.cmpi sgt, %55, %c0_i32_25 : i32
    %57 = arith.extui %56 : i1 to i32
    %58 = arith.sitofp %57 : i32 to f32
    %59 = vector.broadcast %58 : f32 to vector<2x128xf32>
    %60 = arith.mulf %59, %24 : vector<2x128xf32>
    %61 = arith.addf %51, %60 : vector<2x128xf32>
    %c3_i32 = arith.constant 3 : i32
    %62 = vector.broadcast %c3_i32 : i32 to vector<2x128xi32>
    %63 = arith.cmpi eq, %7, %62 : vector<2x128xi32>
    %64 = arith.select %63, %26, %54 : vector<2x128xi1>, vector<2x128xf32>
    %c5 = arith.constant 5 : index
    %65 = memref.load %arg2[%c5] : memref<6xi32, #tpu.memory_space<smem>>
    %c0_i32_26 = arith.constant 0 : i32
    %66 = arith.cmpi sgt, %65, %c0_i32_26 : i32
    %67 = arith.extui %66 : i1 to i32
    %68 = arith.sitofp %67 : i32 to f32
    %69 = vector.broadcast %68 : f32 to vector<2x128xf32>
    %70 = arith.mulf %69, %26 : vector<2x128xf32>
    %71 = arith.addf %61, %70 : vector<2x128xf32>
    %c255_i32 = arith.constant 255 : i32
    %72 = vector.broadcast %c255_i32 : i32 to vector<2x128xi32>
    %73 = arith.cmpi eq, %7, %72 : vector<2x128xi32>
    %74 = arith.select %73, %71, %64 : vector<2x128xi1>, vector<2x128xf32>
    %75 = tpu.iota {dimensions = array<i32: 0>} : vector<2x128xi32>
    %76 = tpu.iota {dimensions = array<i32: 1>} : vector<2x128xi32>
    %c2_i32_27 = arith.constant 2 : i32
    %77 = arith.muli %arg1, %c2_i32_27 : i32
    %78 = vector.broadcast %77 : i32 to vector<2x128xi32>
    %79 = arith.addi %78, %75 : vector<2x128xi32>
    %c128_i32 = arith.constant 128 : i32
    %80 = vector.broadcast %c128_i32 : i32 to vector<2x128xi32>
    %81 = arith.muli %79, %80 : vector<2x128xi32>
    %82 = arith.addi %81, %76 : vector<2x128xi32>
    %83 = vector.broadcast %5 : i32 to vector<2x128xi32>
    %84 = arith.cmpi slt, %82, %83 : vector<2x128xi32>
    %cst_28 = arith.constant dense<true> : vector<2x128xi1>
    %85 = arith.xori %73, %cst_28 : vector<2x128xi1>
    %86 = vector.broadcast %4 : i1 to vector<2x128xi1>
    %87 = arith.ori %85, %86 : vector<2x128xi1>
    %88 = arith.andi %87, %84 : vector<2x128xi1>
    %89 = math.log %29 : vector<2x128xf32>
    %cst_29 = arith.constant 1.000000e-07 : f32
    %90 = vector.broadcast %cst_29 : f32 to vector<2x128xf32>
    %91 = arith.mulf %90, %29 : vector<2x128xf32>
    %92 = arith.addf %74, %91 : vector<2x128xf32>
    %93 = math.log %92 : vector<2x128xf32>
    %94 = arith.subf %89, %93 : vector<2x128xf32>
    %c0_30 = arith.constant 0 : index
    %c0_31 = arith.constant 0 : index
    %95 = vector.load %arg7[%c0_30, %c0_31] : memref<2x128xf32, #tpu.memory_space<vmem>>, vector<2x128xf32>
    %cst_32 = arith.constant 0.000000e+00 : f32
    %96 = vector.broadcast %cst_32 : f32 to vector<2x128xf32>
    %97 = arith.select %88, %94, %96 : vector<2x128xi1>, vector<2x128xf32>
    %98 = arith.addf %95, %97 : vector<2x128xf32>
    %c0_33 = arith.constant 0 : index
    %c0_34 = arith.constant 0 : index
    %99 = vector.load %arg7[%c0_33, %c0_34] : memref<2x128xf32, #tpu.memory_space<vmem>>, vector<2x128xf32>
    tpu.vector_store %arg7[%c0_33, %c0_34], %98 {strides = array<i32>} : memref<2x128xf32, #tpu.memory_space<vmem>>, vector<2x128xf32>,
    %c0_35 = arith.constant 0 : index
    %c0_36 = arith.constant 0 : index
    %100 = vector.load %arg8[%c0_35, %c0_36] : memref<2x128xf32, #tpu.memory_space<vmem>>, vector<2x128xf32>
    %101 = arith.extui %88 : vector<2x128xi1> to vector<2x128xi32>
    %102 = arith.sitofp %101 : vector<2x128xi32> to vector<2x128xf32>
    %103 = arith.addf %100, %102 : vector<2x128xf32>
    %c0_37 = arith.constant 0 : index
    %c0_38 = arith.constant 0 : index
    %104 = vector.load %arg8[%c0_37, %c0_38] : memref<2x128xf32, #tpu.memory_space<vmem>>, vector<2x128xf32>
    tpu.vector_store %arg8[%c0_37, %c0_38], %103 {strides = array<i32>} : memref<2x128xf32, #tpu.memory_space<vmem>>, vector<2x128xf32>,
    %c0_i32_39 = arith.constant 0 : i32
    %105 = arith.cmpi eq, %arg1, %c0_i32_39 : i32
    %106 = arith.extui %105 : i1 to i32
    %c0_i32_40 = arith.constant 0 : i32
    %107 = arith.cmpi ne, %106, %c0_i32_40 : i32
    scf.if %107 {
      %c0_41 = arith.constant 0 : index
      %c0_42 = arith.constant 0 : index
      %108 = vector.load %arg7[%c0_41, %c0_42] : memref<2x128xf32, #tpu.memory_space<vmem>>, vector<2x128xf32>
      %109 = vector.shape_cast %108 : vector<2x128xf32> to vector<1x2x128xf32>
      %cst_43 = arith.constant dense<0.000000e+00> : vector<1xf32>
      %110 = vector.multi_reduction <add>, %109, %cst_43 [1, 2] : vector<1x2x128xf32> to vector<1xf32>
      %111 = vector.shape_cast %110 : vector<1xf32> to vector<1x1x1xf32>
      %112 = vector.extract %111[0, 0, 0] : f32 from vector<1x1x1xf32>
      %113 = vector.broadcast %112 : f32 to vector<1x128xf32>
      %c0_44 = arith.constant 0 : index
      %c0_45 = arith.constant 0 : index
      %c0_46 = arith.constant 0 : index
      %114 = vector.load %arg5[%c0_44, %c0_45, %c0_46] : memref<1x1x128xf32, #tpu.memory_space<vmem>>, vector<1x1x128xf32>
      %115 = vector.shape_cast %114 : vector<1x1x128xf32> to vector<1x128xf32>
      %116 = vector.shape_cast %113 : vector<1x128xf32> to vector<1x1x128xf32>
      tpu.vector_store %arg5[%c0_44, %c0_45, %c0_46], %116 {strides = array<i32>} : memref<1x1x128xf32, #tpu.memory_space<vmem>>, vector<1x1x128xf32>,
      %c0_47 = arith.constant 0 : index
      %c0_48 = arith.constant 0 : index
      %117 = vector.load %arg8[%c0_47, %c0_48] : memref<2x128xf32, #tpu.memory_space<vmem>>, vector<2x128xf32>
      %118 = vector.shape_cast %117 : vector<2x128xf32> to vector<1x2x128xf32>
      %cst_49 = arith.constant dense<0.000000e+00> : vector<1xf32>
      %119 = vector.multi_reduction <add>, %118, %cst_49 [1, 2] : vector<1x2x128xf32> to vector<1xf32>
      %120 = vector.shape_cast %119 : vector<1xf32> to vector<1x1x1xf32>
      %121 = vector.extract %120[0, 0, 0] : f32 from vector<1x1x1xf32>
      %122 = vector.broadcast %121 : f32 to vector<1x128xf32>
      %c0_50 = arith.constant 0 : index
      %c0_51 = arith.constant 0 : index
      %c0_52 = arith.constant 0 : index
      %123 = vector.load %arg6[%c0_50, %c0_51, %c0_52] : memref<1x1x128xf32, #tpu.memory_space<vmem>>, vector<1x1x128xf32>
      %124 = vector.shape_cast %123 : vector<1x1x128xf32> to vector<1x128xf32>
      %125 = vector.shape_cast %122 : vector<1x128xf32> to vector<1x1x128xf32>
      tpu.vector_store %arg6[%c0_50, %c0_51, %c0_52], %125 {strides = array<i32>} : memref<1x1x128xf32, #tpu.memory_space<vmem>>, vector<1x1x128xf32>,
    } else {
    }
    return
  }
  func.func @transform_0(%arg0: i32, %arg1: i32, %arg2: memref<6xi32, #tpu.memory_space<smem>>) -> (i32, i32, i32) {
    %c0_i32 = arith.constant 0 : i32
    %c0_i32_0 = arith.constant 0 : i32
    return %arg0, %arg1, %c0_i32 : i32, i32, i32
  }
  func.func @transform_1(%arg0: i32, %arg1: i32, %arg2: memref<6xi32, #tpu.memory_space<smem>>) -> (i32, i32, i32, i32) {
    %c0_i32 = arith.constant 0 : i32
    %c0_i32_0 = arith.constant 0 : i32
    %c0_i32_1 = arith.constant 0 : i32
    return %arg0, %c0_i32, %arg1, %c0_i32_0 : i32, i32, i32, i32
  }
  func.func @transform_2(%arg0: i32, %arg1: i32, %arg2: memref<6xi32, #tpu.memory_space<smem>>) -> (i32, i32, i32) {
    %c0_i32 = arith.constant 0 : i32
    %c0_i32_0 = arith.constant 0 : i32
    %c0_i32_1 = arith.constant 0 : i32
    return %arg0, %c0_i32, %c0_i32_0 : i32, i32, i32
  }
  func.func @transform_3(%arg0: i32, %arg1: i32, %arg2: memref<6xi32, #tpu.memory_space<smem>>) -> (i32, i32, i32) {
    %c0_i32 = arith.constant 0 : i32
    %c0_i32_0 = arith.constant 0 : i32
    %c0_i32_1 = arith.constant 0 : i32
    return %arg0, %c0_i32, %c0_i32_0 : i32, i32, i32
  }
}

</mosaic_0001>

<bundles_post_ra>
// kernel: tpu_custom_call.1
= control target key start
LH: loop header
LB: loop body
LE: loop exit
PB: predicated region body
PF: predicated region fallthrough
CT: control target
= control target key end

     0   :  { %s853_s15 = smov [#allocation5]   ;;  %s1135_s0 = inlined_call_operand.hbm [shape: s32[6], index: 0, kind: input, shape index: {}]   ;;  %s1136_s1 = inlined_call_operand.hbm [shape: s32[2,2,128], index: 1, kind: input, shape index: {}]   ;;  %s1137_s2 = inlined_call_operand.hbm [shape: f32[2,4,2,128], index: 2, kind: input, shape index: {}]   ;;  %s1138_s3 = inlined_call_operand.hbm [shape: f32[2,1,128], index: 3, kind: output, shape index: {0}]   ;;  %s1139_s4 = inlined_call_operand.hbm [shape: f32[2,1,128], index: 4, kind: output, shape index: {1}]  }
   0x1   :  { %11 = dma.hbm_to_smem %s1135_s0, 16, %s853_s15, [#allocation4] }
   0x2   :  { %811 = dma.done.wait [#allocation4], 16 }
   0x3   :  { %812 = vsyncadd [#allocation4], 4294967280 }
   0x4   :  { %13 = sfence }
   0x5   :  { %14 = vsyncpa [#allocation7], 0 }
   0x6   :  { %16 = vsyncpa [#allocation7 + $0x1], 0 }
   0x7   :  { %17 = vsyncpa [#allocation10], 0 }
   0x8   :  { %19 = vsyncpa [#allocation10 + $0x1], 0 }
   0x9   :  { %20 = vsyncpa [#allocation8], 0 }
   0xa   :  { %22 = vsyncpa [#allocation8 + $0x1], 0 }
   0xb   :  { %23 = vsyncpa [#allocation13], 0 }
   0xc   :  { %25 = vsyncpa [#allocation13 + $0x1], 0  ;;  %s890_s18 = smov 0   ;;  %s892_s19 = smov 0  }
   0xd   :  { %s894_s20 = smov 0   ;;  %s896_s21 = smov 0  }
   0xe   :  { %s898_s0 = smov 0   ;;  %s900_s22 = smov 0  }
   0xf LB: > { %s552_s23 = sadd.s32 4294967295, %s851_s22   ;;  %s553_s24 = sadd.s32 4294967294, %s851_s22   ;;  %s851_s22 = sphi %s900_s22, %s31_s22   ;;  %s847_s0 = sphi %s898_s0, %s1153_s0   ;;  %s843_s21 = sphi %s896_s21, %s1152_s21   ;;  %s839_s20 = sphi %s894_s20, %s1151_s20   ;;  %s835_s19 = sphi %s892_s19, %s1150_s19   ;;  %s831_s18 = sphi %s890_s18, %s1149_s18  }
  0x10   : > { %s43_s25 = sadd.s32 1, %s847_s0  ;;  %s52_s26 = sadd.s32 1, %s839_s20 }
  0x11   : > { %p45_p0 = scmp.ge.s32.totalorder %s43_s25, 2  ;;  %p59_p1 = scmp.ne.s32.totalorder %s839_s20, %s835_s19 }
  0x12   : > { %p60_p2 = scmp.eq.s32.totalorder %s851_s22, 0  ;;  %p65_p3 = scmp.ne.s32.totalorder %s835_s19, %s831_s18 }
  0x13   : > { %s1155_s25 = smov (%p45_p0, %s43_s25), 0  ;;  %p66_p5 = scmp.eq.s32.totalorder %s552_s23, 0 }
  0x14   : > { %p931_p4 = por %p60_p2, %p59_p1  ;;  %s47_s28 = ssub.s32 %s847_s0, %s1155_s25 }
  0x15   : > { %p117_p6 = scmp.eq.s32.totalorder %s552_s23, 1  ;;  %p50_p7 = scmp.eq.s32.totalorder %s47_s28, 0 }
  0x16   : > { %p937_p8 = por %p66_p5, %p65_p3  ;;  %p123_p10 = scmp.eq.s32.totalorder %s553_s24, 1 }
  0x17   : > { %p941_p9 = por %p117_p6, %p59_p1  ;;  %p604_p13 = scmp.lt.s32.totalorder %s851_s22, 2 }
  0x18   : > { %s946_s5 = scalar_select %p50_p7, %s839_s20, %s52_s26  }
  0x19   : > { %p948_p11 = por %p123_p10, %p65_p3  ;;  %s955_s7 = sand.u32 1, %s839_s20  }
  0x1a   : > { %s556_s8 = sshll.u32 %s955_s7, 1  ;;  %s557_s9 = sshll.u32 %s847_s0, 5 }
  0x1b   : > { %s179_s12 = scalar_lea.hbm %s1136_s1, %s557_s9  ;;  %s173_s13 = scalar_lea.vmem [#allocation6], %s556_s8 }
  0x1c   : > { %s181_s14 = sshll.u32 %s173_s13, 4  ;;  %p964_p0 = pnand %p604_p13, %p931_p4  ;;  %s182_s14 = int_to_ptr.vmem [resolvable:$true] %s181_s14 }
  0x1d   : > { %p561_p1 = scmp.ge.s32.totalorder %s851_s22, 1  ;;  %p208_p2 = scmp.lt.s32.totalorder %s851_s22, 3 }
  0x1e   : > { %s170_s16 = scalar_lea.sflag [#allocation7], %s955_s7  ;;  %p681_p3 = pneg %p964_p0 }
  0x1f   : > { %s692_s17 = scalar_lea.vmem %s182_s14, 32  ;;  %s854_s23 = smov [#allocation6]  }
  0x20   : > { %p693_p5 = scmp.ne.s32.totalorder %s182_s14, %s692_s17  ;;  %s697_s24 = sshll.u32 %s854_s23, 4  ;;  %s698_s24 = int_to_ptr.vmem [resolvable:$false] %s697_s24 }
  0x21   : > { %s699_s26 = scalar_lea.vmem %s698_s24, 64  ;;  %p700_p4 = scmp.lt.s32.totalorder %s182_s14, %s698_s24 }
  0x22   : > { %p695_p6 = pnand %p693_p5, %p681_p3  ;;  %p701_p10 = scmp.lt.s32.totalorder %s699_s26, %s692_s17 }
  0x24   : > { %p696_p7 = pneg %p695_p6  ;;  %p702_p13 = por %p701_p10, %p700_p4 }
  0x26   : > { %p703_p12 = pnand %p702_p13, %p696_p7 }
  0x28   : > { %706 = shalt.err (!%p703_p12)
}
  0x29   : > { %593 = dma.hbm_to_vmem [thread:$0]  (!%p964_p0), %s179_s12, 32, %s182_s14, %s170_s16  }
  0x2a   : > { %p982_p5 = pnand %p561_p1, %p208_p2  ;;  %s558_s28 = sshll.u32 %s955_s7, 3 }
  0x2b   : > { %s577_s8 = sshll.u32 %s847_s0, 7  ;;  %s192_s13 = scalar_lea.vmem [#allocation9], %s558_s28 }
  0x2c   : > { %s199_s11 = scalar_lea.hbm %s1137_s2, %s577_s8  ;;  %s200_s17 = sshll.u32 %s192_s13, 4  ;;  %s201_s17 = int_to_ptr.vmem [resolvable:$true] %s200_s17 }
  0x2d   : > { %s189_s23 = scalar_lea.sflag [#allocation10], %s955_s7  ;;  %s720_s24 = scalar_lea.vmem %s201_s17, 128 }
  0x2e   : > { %p721_p12 = scmp.ne.s32.totalorder %s201_s17, %s720_s24  ;;  %s855_s12 = smov [#allocation9]  }
  0x2f   : > { %s725_s14 = sshll.u32 %s855_s12, 4  ;;  %s726_s14 = int_to_ptr.vmem [resolvable:$false] %s725_s14 }
  0x30   : > { %p723_p6 = pnand %p721_p12, %p681_p3  ;;  %s727_s16 = scalar_lea.vmem %s726_s14, 256 }
  0x31   : > { %p728_p1 = scmp.lt.s32.totalorder %s201_s17, %s726_s14  ;;  %p729_p2 = scmp.lt.s32.totalorder %s727_s16, %s720_s24 }
  0x32   : > { %p724_p7 = pneg %p723_p6 }
  0x33   : > { %p730_p4 = por %p729_p2, %p728_p1 }
  0x35   : > { %p731_p10 = pnand %p730_p4, %p724_p7 }
  0x37   : > { %734 = shalt.err (!%p731_p10)
}
  0x38   : > { %s856_s26 = smov 32   ;;  %s857_s28 = smov 2  }
  0x39   : > { %596 = dma.hbm_to_vmem [thread:$0]  (!%p964_p0), %s199_s11, 128, %s201_s17, %s189_s23, %s856_s26, %s856_s26, %s857_s28  }
  0x3a   : > { %212 = sbr.rel (%p982_p5) target bundleno = 373 (0x175), region = 28  ;;  %s1000_s7 = sand.u32 (!%p982_p5), 1, %s835_s19  }
  0x3b   : > { %s562_s8 = sshll.u32 (!%p982_p5), %s1000_s7, 1  ;;  %s215_s9 = scalar_lea.sflag (!%p982_p5), [#allocation7], %s1000_s7 }
  0x3c   : > { %s1004_s10 = scalar_lea.vmem (!%p982_p5), [#allocation6], %s562_s8 }
  0x3f   : > { %814 = dma.done.wait (%p937_p8), %s215_s9, 32  }
  0x40   : > { %816 = vsyncadd (%p937_p8), %s215_s9, 4294967264  ;;  %s563_s15 = sshll.u32 %s1000_s7, 3  ;;  %s224_s27 = scalar_lea.sflag [#allocation10], %s1000_s7 }
  0x41   : > { %s227_s11 = scalar_lea.vmem [#allocation9], %s563_s15 }
  0x42   : > { %818 = dma.done.wait (%p937_p8), %s224_s27, 128  }
  0x43   : > { %820 = vsyncadd (%p937_p8), %s224_s27, 4294967168  ;;  %v858_v0 = vmov 0.0   ;;  %v331_v1 = vlaneseq  ;;  %s1016_s13 = sld [smem:[#allocation5]]  ;;  %v268_v2 = vld [vmem:[%s227_s11] sm:$0x3]  ;;  %vm859_vm1 = vmmov 1  }
  0x44   : > { %262 = vst [vmem:[#allocation2] sm:$0x3] %v858_v0  ;;  %263 = vst [vmem:[#allocation3] sm:$0x3] %v858_v0  ;;  %s1018_s17 = sld [smem:[#allocation5 + $0x1]]  ;;  %vm368_vm11 = vcmask 1041408  }
  0x45   : > { %v565_v3 = vld [vmem:[%s227_s11 + $0x2] sm:$0x3]  ;;  %v566_v4 = vld [vmem:[%s227_s11 + $0x4] sm:$0x3]  ;;  %s1020_s23 = sld [smem:[#allocation5 + $0x2]]  ;;  %v332_v6 = vshrl.u32 %v331_v1, 7 }
  0x46   : > { %v275_v5 = vmax.f32 %v268_v2, %v565_v3  ;;  %v567_v7 = vld [vmem:[%s227_s11 + $0x6] sm:$0x3]  ;;  %s1022_s24 = sld [smem:[#allocation5 + $0x3]]  ;;  %v334_v10 = vand.u32 127, %v331_v1  ;;  %v267_v20 = vld [vmem:[%s1004_s10] sm:$0x3] }
  0x47   : > { %s1024_s29 = sld [smem:[#allocation5 + $0x4]]  ;;  %v338_v11 = vmul.u32 128, %v332_v6  ;;  %vm329_vm0 = vcmp.eq.s32.totalorder %v267_v20, 255  ;;  %vm293_vm7 = vcmp.eq.s32.totalorder %v267_v20, 0  ;;  %vm302_vm8 = vcmp.eq.s32.totalorder %v267_v20, 1  ;;  %s573_s11 = sshll.u32 %s843_s21, 4 }
  0x48   : > { %v276_v8 = vmax.f32 %v275_v5, %v566_v4  ;;  %s1026_s12 = sld [smem:[#allocation5 + $0x5]]  ;;  %vm342_vm2 = vmxor %vm329_vm0, %vm859_vm1  ;;  %vm311_vm9 = vcmp.eq.s32.totalorder %v267_v20, 2  ;;  %vm320_vm10 = vcmp.eq.s32.totalorder %v267_v20, 3 }
  0x49   : > { %p265_p8 = scmp.gt.s32.totalorder %s1016_s13, 0  ;;  %v339_v19 = vadd.s32 %v338_v11, %v334_v10  ;;  %s251_s13 = scalar_lea.vmem [#allocation11], %s1000_s7 }
  0x4a   : > { %v277_v9 = vmax.f32 %v276_v8, %v567_v7  ;;  %v340_v22 = vstv %s1018_s17  ;;  %s411_s17 = sshll.u32 %s251_s13, 4  ;;  %s1063_s17 = int_to_ptr.vmem [resolvable:$true] %s411_s17 }
  0x4b   : > { %p296_p0 = scmp.gt.s32.totalorder %s1020_s23, 0  ;;  %vm341_vm3 = vcmp.lt.s32.totalorder %v339_v19, %v340_v22  ;;  %v359_v24 = vld [vmem:[#allocation3] sm:$0x3]  ;;  %v355_v58 = vld [vmem:[#allocation2] sm:$0x3]  ;;  %s257_s23 = scalar_lea.vmem [#allocation12], %s1000_s7 }
  0x4c   : > { %v278_v12 = vsub.f32 %v268_v2, %v277_v9  ;;  %v281_v13 = vsub.f32 %v565_v3, %v277_v9  ;;  %v284_v14 = vsub.f32 %v566_v4, %v277_v9  ;;  %v287_v15 = vsub.f32 %v567_v7, %v277_v9  ;;  %p305_p3 = scmp.gt.s32.totalorder %s1022_s24, 0  ;;  %s424_s24 = sshll.u32 %s257_s23, 4  ;;  %s1065_s24 = int_to_ptr.vmem [resolvable:$true] %s424_s24 }
  0x4d   : > { %s343_s14 = scalar_select %p265_p8, 1, 0 }
  0x4e   : > { %v279_v16 = vmul.f32 1.442695, %v278_v12  ;;  %v282_v17 = vmul.f32 1.442695, %v281_v13  ;;  %v285_v18 = vmul.f32 1.442695, %v284_v14 }
  0x4f   : > { %v288_v21 = vmul.f32 1.442695, %v287_v15  ;;  %p314_p13 = scmp.gt.s32.totalorder %s1024_s29, 0  ;;  %p323_p5 = scmp.gt.s32.totalorder %s1026_s12, 0  ;;  %v344_v23 = vstv %s343_s14 }
  0x50   : > { %659 = vpow2.f32 %v279_v16  ;;  %s297_s16 = scalar_select %p296_p0, 1, 0  ;;  %vm345_vm4 = vcmp.eq.s32.totalorder %v344_v23, 1 }
  0x51   : > { %661 = vpow2.f32 %v282_v17  ;;  %s306_s26 = scalar_select %p305_p3, 1, 0  ;;  %vm346_vm5 = vmor %vm342_vm2, %vm345_vm4 }
  0x52   : > { %663 = vpow2.f32 %v285_v18  ;;  %s315_s28 = scalar_select %p314_p13, 1, 0  ;;  %vm1042_vm6 = vmand %vm346_vm5, %vm341_vm3 }
  0x53   : > { %665 = vpow2.f32 %v288_v21  ;;  %s324_s8 = scalar_select %p323_p5, 1, 0  ;;  %v572_v26 = vsel %vm1042_vm6, 1.0, %v858_v0 }
  0x54   : > { %s298_s9 = scvt.s32.f32 %s297_s16  ;;  %v362_v27 = vadd.f32 %v572_v26, %v359_v24  ;;  %s307_s10 = scvt.s32.f32 %s306_s26 }
  0x55   : > { %s316_s15 = scvt.s32.f32 %s315_s28  ;;  %s325_s27 = scvt.s32.f32 %s324_s8 }
  0x56   : > { %363 = vst [vmem:[#allocation3] sm:$0x3] %v362_v27  ;;  %v299_v28 = vstv %s298_s9  ;;  %v308_v29 = vstv %s307_s10  ;;  %s1061_s14 = scalar_lea.hbm %s1138_s3, %s573_s11  ;;  %s395_s26 = scalar_lea.sflag [#allocation8], %s1000_s7 }
  0x57   : > { %v317_v31 = vstv %s316_s15  ;;  %v326_v35 = vstv %s325_s27  ;;  %s735_s28 = scalar_lea.vmem %s1063_s17, 16  ;;  %s860_s8 = smov [#allocation11]  }
  0x58   : > { %p736_p12 = scmp.ne.s32.totalorder %s1063_s17, %s735_s28  ;;  %s739_s9 = sshll.u32 %s860_s8, 4  ;;  %s740_s9 = int_to_ptr.vmem [resolvable:$false] %s739_s9 }
  0x59   : > { %s741_s10 = scalar_lea.vmem %s740_s9, 32  ;;  %p742_p1 = scmp.lt.s32.totalorder %s1063_s17, %s740_s9 }
  0x5a   : > { %p737_p6 = pnand %p736_p12, %p941_p9  ;;  %p743_p2 = scmp.lt.s32.totalorder %s741_s10, %s735_s28 }
  0x5c   : > { %p738_p7 = pneg %p737_p6  ;;  %p744_p4 = por %p743_p2, %p742_p1 }
  0x5d   : > { %v660_v30 = vpop.eup %659  ;;  %v381_v62 = vld [vmem:[#allocation3] sm:$0x3] }
  0x5e   : > { %v662_v32 = vpop.eup %661  ;;  %v294_v33 = vsel %vm293_vm7, %v660_v30, 0.0  ;;  %v300_v34 = vmul.f32 %v660_v30, %v299_v28  ;;  %v382_v0 = vsel %vm368_vm11, %v381_v62, 0.0  ;;  %p745_p10 = pnand %p744_p4, %p738_p7 }
  0x5f   : > { %v664_v36 = vpop.eup %663  ;;  %v290_v37 = vadd.f32 %v662_v32, %v660_v30  ;;  %v303_v38 = vsel %vm302_vm8, %v662_v32, %v294_v33  ;;  %v309_v39 = vmul.f32 %v662_v32, %v308_v29 }
  0x60   : > { %v666_v40 = vpop.eup %665  ;;  %v318_v41 = vmul.f32 %v664_v36, %v317_v31  ;;  %v312_v44 = vsel %vm311_vm9, %v664_v36, %v303_v38 }
  0x61   : > { %v291_v42 = vadd.f32 %v664_v36, %v290_v37  ;;  %v310_v43 = vadd.f32 %v309_v39, %v300_v34  ;;  %v327_v45 = vmul.f32 %v666_v40, %v326_v35  ;;  %v321_v48 = vsel %vm320_vm10, %v666_v40, %v312_v44 }
  0x63   : > { %v292_v46 = vadd.f32 %v666_v40, %v291_v42  ;;  %v319_v47 = vadd.f32 %v318_v41, %v310_v43 }
  0x65   : > { %v328_v49 = vadd.f32 %v327_v45, %v319_v47  ;;  %v350_v50 = vmul.f32 1e-07, %v292_v46  ;;  %667 = vlog2.f32 %v292_v46 }
  0x67   : > { %v330_v51 = vsel %vm329_vm0, %v328_v49, %v321_v48 }
  0x68   : > { %v351_v52 = vadd.f32 %v350_v50, %v330_v51 }
  0x6a   : > { %669 = vlog2.f32 %v351_v52 }
  0x72   : > { %v668_v53 = vpop.eup %667 }
  0x73   : > { %v349_v54 = vmul.f32 0.6931472, %v668_v53 }
  0x77   : > { %v670_v55 = vpop.eup %669 }
  0x78   : > { %v353_v56 = vmul.f32 0.6931472, %v670_v55 }
  0x7a   : > { %v354_v57 = vsub.f32 %v349_v54, %v353_v56 }
  0x7c   : > { %v356_v59 = vsel %vm1042_vm6, %v354_v57, 0.0 }
  0x7d   : > { %v357_v60 = vadd.f32 %v356_v59, %v355_v58 }
  0x7f   : > { %358 = vst [vmem:[#allocation2] sm:$0x3] %v357_v60 }
  0x86   : > { %v367_v61 = vld [vmem:[#allocation2] sm:$0x3] }
  0x87   : > { %v369_v63 = vsel %vm368_vm11, %v367_v61, 0.0 }
  0x88   : > { %370 = vadd.xlane.f32.xlu0 %v369_v63 }
  0x8c   : > { %383 = vadd.xlane.f32.xlu0 %v382_v0 }
 0x111   : > { %v371_v1 = vpop.xlane.xlu0 %370 }
 0x112   : > { %v372_v2 = vrot.slane %v371_v1, 4 }
 0x114   : > { %v373_v3 = vadd.f32 %v372_v2, %v371_v1 }
 0x115   : > { %v384_v4 = vpop.xlane.xlu0 %383 }
 0x116   : > { %v374_v5 = vrot.slane %v373_v3, 2  ;;  %v385_v6 = vrot.slane %v384_v4, 4 }
 0x118   : > { %v386_v7 = vadd.f32 %v385_v6, %v384_v4  ;;  %v375_v8 = vadd.f32 %v374_v5, %v373_v3 }
 0x11a   : > { %v387_v9 = vrot.slane %v386_v7, 2  ;;  %v376_v10 = vrot.slane %v375_v8, 1 }
 0x11c   : > { %v388_v11 = vadd.f32 %v387_v9, %v386_v7  ;;  %v377_v12 = vadd.f32 %v376_v10, %v375_v8 }
 0x11e   : > { %578 = vpush %v377_v12  ;;  %v389_v13 = vrot.slane %v388_v11, 1 }
 0x120   : > { %v390_v14 = vadd.f32 %v389_v13, %v388_v11 }
 0x122   : > { %580 = vpush %v390_v14 }
 0x14f   : > { %s579_s16 = spop %578 }
 0x150   : > { %v379_v15 = vstv %s579_s16 }
 0x151   : > { %380 = vst [vmem:[%s251_s13] sm:$0x1] %v379_v15 }
 0x152   : > { %748 = shalt.err (!%p745_p10)
}
 0x153   : > { %s749_s15 = scalar_lea.hbm %s1061_s14, 16  ;;  %s753_s29 = scalar_lea.hbm %s1138_s3, 32 }
 0x154   : > { %p750_p8 = scmp.ne.s32.totalorder %s1061_s14, %s749_s15  ;;  %p754_p13 = scmp.lt.s32.totalorder %s1061_s14, %s1138_s3 }
 0x155   : > { %p755_p5 = scmp.lt.s32.totalorder %s753_s29, %s749_s15 }
 0x156   : > { %p751_p0 = pnand %p750_p8, %p941_p9 }
 0x157   : > { %p756_p12 = por %p755_p5, %p754_p13 }
 0x158   : > { %p752_p3 = pneg %p751_p0 }
 0x15a   : > { %p757_p6 = pnand %p756_p12, %p752_p3 }
 0x15c   : > { %760 = shalt.err (!%p757_p6)
}
 0x15d   : > { %586 = dma.vmem_to_hbm [thread:$0]  (%p941_p9), %s1063_s17, 16, %s1061_s14, %s395_s26  }
 0x15e   : > { %s581_s28 = spop %580  ;;  %s422_s10 = scalar_lea.hbm %s1139_s4, %s573_s11 }
 0x15f   : > { %v392_v16 = vstv %s581_s28  ;;  %s399_s15 = scalar_lea.sflag [#allocation13], %s1000_s7  ;;  %s761_s27 = scalar_lea.vmem %s1065_s24, 16 }
 0x160   : > { %393 = vst [vmem:[%s257_s23] sm:$0x1] %v392_v16  ;;  %p762_p7 = scmp.ne.s32.totalorder %s1065_s24, %s761_s27  ;;  %s861_s13 = smov [#allocation12]  }
 0x161   : > { %s765_s29 = sshll.u32 %s861_s13, 4  ;;  %s766_s29 = int_to_ptr.vmem [resolvable:$false] %s765_s29 }
 0x162   : > { %p763_p1 = pnand %p762_p7, %p941_p9  ;;  %s767_s12 = scalar_lea.vmem %s766_s29, 32 }
 0x163   : > { %p768_p4 = scmp.lt.s32.totalorder %s1065_s24, %s766_s29  ;;  %p769_p10 = scmp.lt.s32.totalorder %s767_s12, %s761_s27 }
 0x164   : > { %p764_p2 = pneg %p763_p1 }
 0x165   : > { %p770_p8 = por %p769_p10, %p768_p4 }
 0x167   : > { %p771_p0 = pnand %p770_p8, %p764_p2 }
 0x169   : > { %774 = shalt.err (!%p771_p0)
}
 0x16a   : > { %s775_s21 = scalar_lea.hbm %s422_s10, 16  ;;  %s779_s17 = scalar_lea.hbm %s1139_s4, 32 }
 0x16b   : > { %p776_p3 = scmp.ne.s32.totalorder %s422_s10, %s775_s21  ;;  %p780_p12 = scmp.lt.s32.totalorder %s422_s10, %s1139_s4 }
 0x16c   : > { %p781_p6 = scmp.lt.s32.totalorder %s779_s17, %s775_s21 }
 0x16d   : > { %p777_p13 = pnand %p776_p3, %p941_p9 }
 0x16e   : > { %p782_p7 = por %p781_p6, %p780_p12 }
 0x16f   : > { %p778_p5 = pneg %p777_p13 }
 0x171   : > { %p783_p1 = pnand %p782_p7, %p778_p5 }
 0x173   : > { %786 = shalt.err (!%p783_p1)
}
 0x174   : > { %587 = dma.vmem_to_hbm [thread:$0]  (%p941_p9), %s1065_s24, 16, %s422_s10, %s399_s15  }
 0x175 PF: > { %s436_s26 = sand.u32 1, %s831_s18   ;;  %p1148_p2 = scmp.ge.s32.totalorder %s851_s22, 2 }
 0x176   : > { %s437_s16 = scalar_lea.sflag [#allocation8], %s436_s26 }
 0x177   : > { %p598_p4 = pnand %p1148_p2, %p948_p11 }
 0x179   : > { %p599_p10 = pneg %p598_p4 }
 0x17b   : > { %822 = dma.done.wait (%p599_p10), %s437_s16, 16  }
 0x17c   : > { %824 = vsyncadd (%p599_p10), %s437_s16, 4294967280  ;;  %s445_s28 = scalar_lea.sflag [#allocation13], %s436_s26 }
 0x17d   : > { %826 = dma.done.wait (%p599_p10), %s445_s28, 16  }
 0x17e   : > { %828 = vsyncadd (%p599_p10), %s445_s28, 4294967280  ;;  %s31_s22 = sadd.s32 1, %s851_s22   ;;  %s1149_s18 = smov %s835_s19 }
 0x17f   : > { %p28_p8 = scmp.ge.s32.totalorder %s31_s22, 4   ;;  %s1150_s19 = smov %s839_s20 }
 0x180   : > { %s1151_s20 = smov %s946_s5  ;;  %s1152_s21 = smov %s847_s0 }
 0x181   : > { %s1153_s0 = smov %s1155_s25  ;;  %30 = sbr.rel (!%p28_p8) target bundleno = 15 (0xf), region = 114 }
 0x186   :  { %449 = vsyncpa [#allocation7], 1 }
 0x187   :  { %451 = vsyncpa [#allocation7 + $0x1], 1 }
 0x188   :  { %452 = vsyncpa [#allocation10], 1 }
 0x189   :  { %454 = vsyncpa [#allocation10 + $0x1], 1 }
 0x18a   :  { %455 = vsyncpa [#allocation8], 1 }
 0x18b   :  { %457 = vsyncpa [#allocation8 + $0x1], 1 }
 0x18c   :  { %458 = vsyncpa [#allocation13], 1 }
 0x18d   :  { %460 = vsyncpa [#allocation13 + $0x1], 1 }

</bundles_post_ra>
